<compile_context>
chip_gen: v7x
topology: tpu7x:2x2x1
jax: 0.10.0
libtpu: 0.0.40
codegen_flags: <defaults>
</compile_context>

<pallas_src>
import functools

import jax
import jax.numpy as jnp
from jax.experimental import pallas as pl
from jax.experimental.pallas import tpu as pltpu


def _sa_loss_lane_kernel(x_ref, o_ref, *, hw, use_mxu_sums):
    # x_ref: (bt, 3*hw) native dtype in VMEM; o_ref: (1, 1) f32 partial sum.
    inv_hw = 1.0 / hw
    if use_mxu_sums:
        ones_col = jnp.ones((hw, 1), dtype=x_ref.dtype)
    ssq = None
    for c in range(3):
        raw = x_ref[:, c * hw:(c + 1) * hw]          # static lane slice (128-aligned)
        ch = raw.astype(jnp.float32)
        if use_mxu_sums:
            # Spatial sum on the (otherwise idle) MXU; exact for sub-32-bit
            # inputs since the MXU accumulates in f32.
            ssum = jnp.dot(raw, ones_col, preferred_element_type=jnp.float32)
        else:
            ssum = jnp.sum(ch, axis=-1, keepdims=True)
        d = ch - ssum * inv_hw                       # exact per-image mean (full HW in block)
        ssq = d * d if ssq is None else ssq + d * d  # in-place channel accumulation
    o_ref[...] = jnp.sum(jnp.sqrt(ssq)).reshape(1, 1)


def _sa_loss_chan_kernel(x_ref, o_ref):
    # Fallback path for hw % 128 != 0.  x_ref: (bt, 3, hw); o_ref: (1, 1) f32.
    hw = x_ref.shape[2]
    inv_hw = 1.0 / hw
    ssq = None
    for c in range(3):
        ch = x_ref[:, c, :].astype(jnp.float32)
        d = ch - jnp.sum(ch, axis=-1, keepdims=True) * inv_hw
        ssq = d * d if ssq is None else ssq + d * d
    o_ref[...] = jnp.sum(jnp.sqrt(ssq)).reshape(1, 1)


def _physical_vmem_bytes():
    try:
        return int(pltpu.get_tpu_info().vmem_capacity_bytes)
    except Exception:
        return 64 << 20   # conservative (v7x per-TC); v5e/v6e have 128 MiB


def _sublane_multiple(dtype):
    # Second-minor tiling multiple so Mosaic does not insert relayouts:
    # f32 -> 8, bf16 -> 16, int8/fp8 -> 32.
    return max(8, 32 // jnp.dtype(dtype).itemsize)


def _pick_batch_tile(batch, bytes_per_image, target_block_bytes, sublane_mult):
    """Largest legal batch tile that fits the byte budget, preferring >= 2 grid
    steps so the "parallel" batch axis lands on both TensorCores on v7x."""
    candidates = [bt for bt in range(1, batch + 1)
                  if batch % bt == 0 and (bt == batch or bt % sublane_mult == 0)]
    fitting = [bt for bt in candidates if bt * bytes_per_image <= target_block_bytes]
    multi = [bt for bt in fitting if batch // bt >= 2]
    if multi:
        return max(multi)
    if fitting:
        return max(fitting)
    return min(candidates)   # nothing fits the budget: smallest legal tile


def sa_loss(x_nchw, *, batch_tile=None, target_block_bytes=None):
    """x_nchw: (B, 3, H, W) array (any float dtype). Returns scalar f32 loss."""
    bsz, c, h, w = x_nchw.shape
    assert c == 3, "Sa_Loss expects 3 channels (r, g, b)"
    hw = h * w
    dtype = x_nchw.dtype
    itemsize = jnp.dtype(dtype).itemsize
    lane_path = (hw % 128 == 0)   # lane-dense channel slices at static offsets

    phys_vmem = _physical_vmem_bytes()
    if target_block_bytes is None:
        # Peak VMEM ~= 2 * input block (double-buffered DMA) + ~3 f32 channel
        # slabs of live intermediates; keep that within ~75% of physical VMEM.
        budget = min(int(0.75 * phys_vmem), 96 << 20)
        f32_per_block_byte = 4.0 / (3.0 * itemsize)   # one f32 channel slab per input-block byte
        denom = 2.0 + 3.0 * f32_per_block_byte
        if not lane_path:
            denom += 2.0   # (bt, 3, hw) block pads sublanes 3 -> 8 in VMEM
        target_block_bytes = int(budget / denom)

    bytes_per_image = c * hw * itemsize
    sub_mult = _sublane_multiple(dtype)
    bt = batch_tile if batch_tile is not None else _pick_batch_tile(
        bsz, bytes_per_image, target_block_bytes, sub_mult)
    assert bsz % bt == 0 and (bt == bsz or bt % 8 == 0), (bsz, bt)
    grid_b = bsz // bt
    block_bytes = bt * bytes_per_image
    block_vmem = block_bytes if lane_path else (block_bytes * 8 + 2) // 3
    f32_slab = bt * hw * 4
    vmem_limit = int(2 * block_vmem + 4 * f32_slab + (4 << 20))
    vmem_limit = min(max(vmem_limit, 32 << 20), phys_vmem)
    # TODO(synk): if a single image (3*H*W) exceeds VMEM even at the smallest
    # legal batch tile, a two-pass (mean, then deviation) spatial tiling is
    # required; not implemented here.

    if lane_path:
        kernel = functools.partial(_sa_loss_lane_kernel, hw=hw,
                                   use_mxu_sums=itemsize < 4)
        x_in = x_nchw.reshape(bsz, c * hw)        # free, contiguous reshape (no HBM pass)
        in_spec = pl.BlockSpec((bt, c * hw), lambda i: (i, 0))
    else:
        kernel = _sa_loss_chan_kernel
        x_in = x_nchw.reshape(bsz, c, hw)         # free, contiguous reshape
        in_spec = pl.BlockSpec((bt, c, hw), lambda i: (i, 0, 0))

    partial_sums = pl.pallas_call(
        kernel,
        out_shape=jax.ShapeDtypeStruct((grid_b, 1), jnp.float32),
        grid_spec=pltpu.PrefetchScalarGridSpec(
            num_scalar_prefetch=0,
            grid=(grid_b,),
            in_specs=[in_spec],
            out_specs=pl.BlockSpec((1, 1), lambda i: (i, 0)),
        ),
        compiler_params=pltpu.CompilerParams(
            dimension_semantics=("parallel",),    # batch tiles shard over both TCs on v7x
            vmem_limit_bytes=vmem_limit,
        ),
    )(x_in)

    # Sum partials, divide by the total element count once (exact tiled mean).
    return (jnp.sum(partial_sums) / float(bsz * hw)).astype(jnp.float32)


def _sa_loss_ref(x_nchw):
    # Pure-JAX reference mirroring the PyTorch forward exactly.
    x = x_nchw.astype(jnp.float32)
    mean_rgb = jnp.mean(x, axis=(2, 3), keepdims=True)
    d = x - mean_rgb
    k = jnp.sqrt(jnp.sum(d * d, axis=1))
    return jnp.mean(k)


if __name__ == "__main__":
    # Small shape consistent with the module: batch=2, channels=3 (r,g,b), 16x16.
    x = jax.random.uniform(jax.random.PRNGKey(0), (2, 3, 16, 16), dtype=jnp.float32)
    out = jax.block_until_ready(sa_loss(x))
    ref = jax.block_until_ready(_sa_loss_ref(x))
    assert jnp.allclose(out, ref, rtol=1e-5, atol=1e-6), (out, ref)

    # Multi-step "parallel" batch grid (bt=8 -> grid_b=2) on the lane-slice path.
    x16 = jax.random.uniform(jax.random.PRNGKey(1), (16, 3, 16, 16), dtype=jnp.float32)
    out16 = jax.block_until_ready(sa_loss(x16))
    ref16 = jax.block_until_ready(_sa_loss_ref(x16))
    assert jnp.allclose(out16, ref16, rtol=1e-5, atol=1e-6), (out16, ref16)

    # Native bf16 DMA, dtype-aware tile (16), MXU-offloaded spatial sums.
    xb = jax.random.uniform(jax.random.PRNGKey(2), (32, 3, 16, 16),
                            dtype=jnp.float32).astype(jnp.bfloat16)
    outb = jax.block_until_ready(sa_loss(xb))
    refb = jax.block_until_ready(_sa_loss_ref(xb))
    assert jnp.allclose(outb, refb, rtol=1e-3, atol=1e-3), (outb, refb)

    # Non-128-aligned spatial extent exercises the (B, 3, HW) fallback path.
    xo = jax.random.uniform(jax.random.PRNGKey(3), (2, 3, 12, 12), dtype=jnp.float32)
    outo = jax.block_until_ready(sa_loss(xo))
    refo = jax.block_until_ready(_sa_loss_ref(xo))
    assert jnp.allclose(outo, refo, rtol=1e-5, atol=1e-6), (outo, refo)

    print("KERNEL_OK")
</pallas_src>

<mosaic_0001>
module attributes {stable_mosaic.version = 11 : i64} {
  func.func @_sa_loss_lane_kernel(%arg0: i32, %arg1: memref<2x768xf32, #tpu.memory_space<vmem>>, %arg2: memref<1x1xf32, #tpu.memory_space<vmem>>) attributes {dimension_semantics = [#tpu.dimension_semantics<parallel>], iteration_bounds = array<i64: 1>, scalar_prefetch = 0 : i64, scratch_operands = 0 : i64, tpu.core_type = #tpu.core_type<tc>, window_params = [{transform_indices = @transform_0, window_bounds = array<i64: 2, 768>}, {transform_indices = @transform_1, window_bounds = array<i64: 1, 1>}]} {
    %c0 = arith.constant 0 : index
    %c0_0 = arith.constant 0 : index
    %0 = vector.load %arg1[%c0, %c0_0] : memref<2x768xf32, #tpu.memory_space<vmem>>, vector<2x256xf32>
    %cst = arith.constant dense<0.000000e+00> : vector<2xf32>
    %1 = vector.multi_reduction <add>, %0, %cst [1] : vector<2x256xf32> to vector<2xf32>
    %2 = vector.shape_cast %1 : vector<2xf32> to vector<2x1xf32>
    %cst_1 = arith.constant 3.906250e-03 : f32
    %3 = vector.broadcast %cst_1 : f32 to vector<2x1xf32>
    %4 = arith.mulf %2, %3 : vector<2x1xf32>
    %5 = vector.broadcast %4 : vector<2x1xf32> to vector<2x256xf32>
    %6 = arith.subf %0, %5 : vector<2x256xf32>
    %7 = arith.mulf %6, %6 : vector<2x256xf32>
    %c0_2 = arith.constant 0 : index
    %c256 = arith.constant 256 : index
    %8 = vector.load %arg1[%c0_2, %c256] : memref<2x768xf32, #tpu.memory_space<vmem>>, vector<2x256xf32>
    %cst_3 = arith.constant dense<0.000000e+00> : vector<2xf32>
    %9 = vector.multi_reduction <add>, %8, %cst_3 [1] : vector<2x256xf32> to vector<2xf32>
    %10 = vector.shape_cast %9 : vector<2xf32> to vector<2x1xf32>
    %cst_4 = arith.constant 3.906250e-03 : f32
    %11 = vector.broadcast %cst_4 : f32 to vector<2x1xf32>
    %12 = arith.mulf %10, %11 : vector<2x1xf32>
    %13 = vector.broadcast %12 : vector<2x1xf32> to vector<2x256xf32>
    %14 = arith.subf %8, %13 : vector<2x256xf32>
    %15 = arith.mulf %14, %14 : vector<2x256xf32>
    %16 = arith.addf %7, %15 : vector<2x256xf32>
    %c0_5 = arith.constant 0 : index
    %c512 = arith.constant 512 : index
    %17 = vector.load %arg1[%c0_5, %c512] : memref<2x768xf32, #tpu.memory_space<vmem>>, vector<2x256xf32>
    %cst_6 = arith.constant dense<0.000000e+00> : vector<2xf32>
    %18 = vector.multi_reduction <add>, %17, %cst_6 [1] : vector<2x256xf32> to vector<2xf32>
    %19 = vector.shape_cast %18 : vector<2xf32> to vector<2x1xf32>
    %cst_7 = arith.constant 3.906250e-03 : f32
    %20 = vector.broadcast %cst_7 : f32 to vector<2x1xf32>
    %21 = arith.mulf %19, %20 : vector<2x1xf32>
    %22 = vector.broadcast %21 : vector<2x1xf32> to vector<2x256xf32>
    %23 = arith.subf %17, %22 : vector<2x256xf32>
    %24 = arith.mulf %23, %23 : vector<2x256xf32>
    %25 = arith.addf %16, %24 : vector<2x256xf32>
    %26 = math.sqrt %25 : vector<2x256xf32>
    %27 = vector.shape_cast %26 : vector<2x256xf32> to vector<1x2x256xf32>
    %cst_8 = arith.constant dense<0.000000e+00> : vector<1xf32>
    %28 = vector.multi_reduction <add>, %27, %cst_8 [1, 2] : vector<1x2x256xf32> to vector<1xf32>
    %29 = vector.shape_cast %28 : vector<1xf32> to vector<1x1x1xf32>
    %30 = vector.extract %29[0, 0, 0] : f32 from vector<1x1x1xf32>
    %31 = vector.broadcast %30 : f32 to vector<1x1xf32>
    %c0_9 = arith.constant 0 : index
    %c0_10 = arith.constant 0 : index
    %32 = vector.load %arg2[%c0_9, %c0_10] : memref<1x1xf32, #tpu.memory_space<vmem>>, vector<1x1xf32>
    tpu.vector_store %arg2[%c0_9, %c0_10], %31 {strides = array<i32>} : memref<1x1xf32, #tpu.memory_space<vmem>>, vector<1x1xf32>,
    return
  }
  func.func @transform_0(%arg0: i32) -> (i32, i32) {
    %c0_i32 = arith.constant 0 : i32
    %c0_i32_0 = arith.constant 0 : i32
    return %arg0, %c0_i32 : i32, i32
  }
  func.func @transform_1(%arg0: i32) -> (i32, i32) {
    %c0_i32 = arith.constant 0 : i32
    %c0_i32_0 = arith.constant 0 : i32
    return %arg0, %c0_i32 : i32, i32
  }
}

</mosaic_0001>

<bundles_post_ra>
// kernel: tpu_custom_call.1
= control target key start
LH: loop header
LB: loop body
LE: loop exit
PB: predicated region body
PF: predicated region fallthrough
CT: control target
= control target key end

     0   :  { %6 = vsyncpa [#allocation3], 0  ;;  %s261_s0 = inlined_call_operand.hbm [shape: f32[2,768], index: 0, kind: input, shape index: {}]   ;;  %s262_s1 = inlined_call_operand.hbm [shape: f32[1,1], index: 1, kind: output, shape index: {}]  }
   0x1   :  { %7 = vsyncpa [#allocation4], 0  ;;  %s215_s6 = smov [#allocation2]   ;;  %s167_s10 = scalar_lea.hbm %s261_s0, 192 }
   0x2   :  { %s14_s7 = sshll.u32 %s215_s6, 4  ;;  %p168_p0 = scmp.ne.s32.totalorder %s261_s0, %s167_s10  ;;  %s15_s7 = int_to_ptr.vmem [resolvable:$true] %s14_s7 }
   0x3   :  { %p171_p1 = scmp.lt.u32.totalorder %s167_s10, %s261_s0 }
   0x5   :  { %p173_p2 = pnand %p171_p1, %p168_p0 }
   0x7   :  { %176 = shalt.err (!%p173_p2)
}
   0x8   :  { %s177_s15 = scalar_lea.vmem %s15_s7, 192  ;;  %p182_p4 = scmp.lt.s32.totalorder %s15_s7, %s15_s7 }
   0x9   :  { %p178_p3 = scmp.ne.s32.totalorder %s15_s7, %s177_s15  ;;  %p183_p5 = scmp.lt.s32.totalorder %s177_s15, %s177_s15 }
   0xb   :  { %p184_p6 = por %p183_p5, %p182_p4 }
   0xd   :  { %p185_p7 = pnand %p184_p6, %p178_p3 }
   0xf   :  { %188 = shalt.err (!%p185_p7)
}
  0x10   :  { %17 = dma.hbm_to_vmem [thread:$0]  %s261_s0, 192, %s15_s7, [#allocation3]  }
  0x11   :  { %211 = dma.done.wait [#allocation3], 192  }
  0x12   :  { %212 = vsyncadd [#allocation3], 4294967104  ;;  %v26_v0 = vlaneseq  ;;  %v216_v1 = vmov 1983009808   ;;  %vm33_vm0 = vcmask 1041408   ;;  %s218_s0 = smov [#allocation5]  }
  0x13   :  { %v24_v2 = vunpack.c.l.s4 %v216_v1  ;;  %v21_v6 = vld [vmem:[#allocation2] sm:$0xf]  ;;  %v51_v7 = vld [vmem:[#allocation2 + $0x4] sm:$0xf]  ;;  %v81_v8 = vld [vmem:[#allocation2 + $0x8] sm:$0xf] }
  0x14   :  { %v27_v3 = vshrl.u32 %v26_v0, 7  ;;  %v217_v24 = vmov 269488144   ;;  %s150_s18 = sshll.u32 %s218_s0, 4  ;;  %vm142_vm3 = vcmask 0   ;;  %s151_s18 = int_to_ptr.vmem [resolvable:$true] %s150_s18 }
  0x15   :  { %v25_v4 = vunpack.c.0.s8 %v24_v2  ;;  %v42_v25 = vunpack.c.l.s4 %v217_v24  ;;  %s189_s20 = scalar_lea.vmem %s151_s18, 16  ;;  %s193_s21 = scalar_lea.vmem %s151_s18, 32 }
  0x16   :  { %p190_p8 = scmp.ne.s32.totalorder %s151_s18, %s189_s20  ;;  %p194_p9 = scmp.lt.s32.totalorder %s151_s18, %s151_s18 }
  0x17   :  { %v28_v5 = vsub.s32 %v25_v4, %v27_v3  ;;  %v43_v26 = vunpack.c.0.s8 %v42_v25  ;;  %p195_p10 = scmp.lt.s32.totalorder %s193_s21, %s189_s20 }
  0x19   :  { %v29_v9 = vrot.slane %v21_v6, %v28_v5  ;;  %v59_v10 = vrot.slane %v51_v7, %v28_v5  ;;  %v89_v11 = vrot.slane %v81_v8, %v28_v5  ;;  %v46_v27 = vsub.s32 %v43_v26, %v27_v3  ;;  %p196_p11 = por %p195_p10, %p194_p9 }
  0x1b   :  { %v30_v12 = vcombine.high %v29_v9, %v29_v9  ;;  %v34_v13 = vsel %vm33_vm0, %v29_v9, 0.0  ;;  %v60_v14 = vcombine.high %v59_v10, %v59_v10  ;;  %v90_v15 = vcombine.high %v89_v11, %v89_v11  ;;  %p197_p12 = pnand %p196_p11, %p190_p8 }
  0x1c   :  { %v93_v16 = vsel %vm33_vm0, %v89_v11, 0.0  ;;  %v63_v18 = vsel %vm33_vm0, %v59_v10, 0.0 }
  0x1d   :  { %v35_v17 = vsel %vm33_vm0, %v30_v12, 0.0  ;;  %v64_v19 = vsel %vm33_vm0, %v60_v14, 0.0  ;;  %v94_v21 = vsel %vm33_vm0, %v90_v15, 0.0 }
  0x1e   :  { %v36_v20 = vadd.f32 %v35_v17, %v34_v13  ;;  %v95_v22 = vadd.f32 %v94_v21, %v93_v16  ;;  %v65_v23 = vadd.f32 %v64_v19, %v63_v18 }
  0x20   :  { %37 = vadd.xlane.f32.xlu0 %v36_v20  ;;  %96 = vadd.xlane.f32.xlu1 %v95_v22 }
  0x24   :  { %66 = vadd.xlane.f32.xlu0 %v65_v23 }
  0xad   :  { %v38_v28 = vpop.xlane.xlu0 %37  ;;  %v97_v30 = vpop.xlane.xlu1 %96 }
  0xae   :  { %v39_v29 = vmul.f32 0.00390625, %v38_v28  ;;  %v98_v31 = vmul.f32 0.00390625, %v97_v30 }
  0xb0   :  { %v47_v32 = vrot.slane %v39_v29, %v46_v27  ;;  %v106_v34 = vrot.slane %v98_v31, %v46_v27 }
  0xb1   :  { %v67_v33 = vpop.xlane.xlu0 %66 }
  0xb2   :  { %v68_v35 = vmul.f32 0.00390625, %v67_v33  ;;  %v49_v36 = vsub.f32 %v21_v6, %v47_v32  ;;  %v108_v38 = vsub.f32 %v81_v8, %v106_v34 }
  0xb4   :  { %v76_v37 = vrot.slane %v68_v35, %v46_v27  ;;  %v50_v40 = vmul.f32 %v49_v36, %v49_v36  ;;  %v109_v42 = vmul.f32 %v108_v38, %v108_v38 }
  0xb6   :  { %v78_v39 = vsub.f32 %v51_v7, %v76_v37 }
  0xb8   :  { %v79_v41 = vmul.f32 %v78_v39, %v78_v39 }
  0xba   :  { %v80_v43 = vadd.f32 %v79_v41, %v50_v40 }
  0xbc   :  { %v110_v44 = vadd.f32 %v109_v42, %v80_v43 }
  0xbe   :  { %165 = vrsqrt.f32 %v110_v44  ;;  %vm113_vm1 = vcmp.eq.f32.partialorder %v110_v44, inf  ;;  %v116_v47 = vand.u32 2147483648, %v110_v44  ;;  %vm115_vm2 = vcmp.eq.f32.partialorder %v110_v44, 0.0 }
  0xc8   :  { %v166_v45 = vpop.eup %165 }
  0xc9   :  { %v112_v46 = vmul.f32 %v166_v45, %v110_v44 }
  0xcb   :  { %v114_v48 = vsel %vm113_vm1, %v110_v44, %v112_v46 }
  0xcc   :  { %v117_v49 = vsel %vm115_vm2, %v116_v47, %v114_v48 }
  0xcd   :  { %v125_v50 = vrot.slane %v117_v49, %v28_v5 }
  0xcf   :  { %v126_v51 = vcombine.high %v125_v50, %v125_v50  ;;  %v129_v52 = vsel %vm33_vm0, %v125_v50, 0.0 }
  0xd1   :  { %v130_v53 = vsel %vm33_vm0, %v126_v51, 0.0 }
  0xd2   :  { %v131_v54 = vadd.f32 %v130_v53, %v129_v52 }
  0xd4   :  { %132 = vadd.xlane.f32.xlu1 %v131_v54 }
 0x161   :  { %v133_v55 = vpop.xlane.xlu1 %132 }
 0x162   :  { %v134_v56 = vrot.slane %v133_v55, 4 }
 0x164   :  { %v135_v57 = vadd.f32 %v134_v56, %v133_v55 }
 0x166   :  { %v136_v58 = vrot.slane %v135_v57, 2 }
 0x168   :  { %v137_v59 = vadd.f32 %v136_v58, %v135_v57 }
 0x16a   :  { %v138_v60 = vrot.slane %v137_v59, 1 }
 0x16c   :  { %v139_v61 = vadd.f32 %v138_v60, %v137_v59 }
 0x16e   :  { %159 = vpush %v139_v61 }
 0x19f   :  { %s160_s19 = spop %159 }
 0x1a0   :  { %v141_v62 = vstv %s160_s19 }
 0x1a1   :  { %143 = vst.msk [vmem:[#allocation5] sm:$0x1] %vm142_vm3, %v141_v62 }
 0x1a2   :  { %200 = shalt.err (!%p197_p12)
}
 0x1a3   :  { %s201_s24 = scalar_lea.hbm %s262_s1, 16 }
 0x1a4   :  { %p202_p13 = scmp.ne.s32.totalorder %s262_s1, %s201_s24  ;;  %p205_p0 = scmp.lt.u32.totalorder %s201_s24, %s262_s1 }
 0x1a6   :  { %p207_p1 = pnand %p205_p0, %p202_p13 }
 0x1a8   :  { %210 = shalt.err (!%p207_p1)
}
 0x1a9   :  { %153 = dma.vmem_to_hbm [thread:$0]  %s151_s18, 16, %s262_s1, [#allocation4]  }
 0x1aa   :  { %213 = dma.done.wait [#allocation4], 16  }
 0x1ab   :  { %214 = vsyncadd [#allocation4], 4294967280 }
 0x1ac   :  { %157 = vsyncpa [#allocation3], 1 }
 0x1ad   :  { %158 = vsyncpa [#allocation4], 1 }

</bundles_post_ra>
